<compile_context>
chip_gen: v6e
topology: v6e:2x2x1
jax: 0.10.0
libtpu: 0.0.40
codegen_flags: <defaults>
</compile_context>

<pallas_src>
import jax
import jax.numpy as jnp
from jax.experimental import pallas as pl
from jax.experimental.pallas import tpu as pltpu


def mlp_kernel(x_ref, w1_ref, b1_ref, w2_ref, b2_ref, o_ref):
    # h_relu = max(x @ W1^T + b1, 0)        (W1 pre-transposed: [D_in, H])
    h = jnp.dot(x_ref[...], w1_ref[...], preferred_element_type=jnp.float32)
    h = jnp.maximum(h + b1_ref[...], 0.0)                  # (tn, H) + (1, H), f32
    # y = h_relu @ W2^T + (b2 + external bias)  (W2 pre-transposed: [H, D_out])
    # For f32 weights the astype is a no-op; for bf16 weights it enables the
    # MXU's native bf16 rate (one extra rounding step vs pure f32 reference).
    y = jnp.dot(h.astype(w2_ref.dtype), w2_ref[...],
                preferred_element_type=jnp.float32)
    o_ref[...] = (y + b2_ref[...]).astype(o_ref.dtype)     # (tn, D_out) + (1, D_out)


def _choose_row_tile(N):
    """Row-tile policy (perf review): single full-batch block for N <= 1024;
    otherwise the largest dividing tile from {2048, 1024, 512, ..., 8}; fall
    back to one full block if nothing divides."""
    if N <= 1024:
        return N
    for t in (2048, 1024, 512, 256, 128, 64, 32, 16, 8):
        if N % t == 0:
            return t
    return N


def extended_model_forward(x, w1_t, b1, w2_t, b2, bias, *, tn=None):
    """x: [N, D_in]; w1_t: [D_in, H]; b1: [H] or [1, H]; w2_t: [H, D_out];
    b2: [D_out] or [1, D_out]; bias broadcastable to [1, D_out].
    Returns y: [N, D_out] (same dtype as x)."""
    N, D_in = x.shape
    H = w1_t.shape[1]
    D_out = w2_t.shape[1]
    if tn is None:
        tn = _choose_row_tile(N)
    assert N % tn == 0, (N, tn)

    b1 = jnp.reshape(b1, (1, H)).astype(jnp.float32)
    # Fold the external bias into the second-layer bias (broadcast over rows).
    b2_eff = (jnp.reshape(b2, (1, D_out)).astype(jnp.float32)
              + jnp.broadcast_to(bias, (1, D_out)).astype(jnp.float32))

    itemsize = lambda a: a.size * a.dtype.itemsize
    cost = pl.CostEstimate(
        flops=2 * N * D_in * H + 2 * N * H * D_out,
        transcendentals=0,
        bytes_accessed=(itemsize(x) + itemsize(w1_t) + itemsize(b1)
                        + itemsize(w2_t) + itemsize(b2_eff)
                        + N * D_out * x.dtype.itemsize),
    )

    def const_spec(shape):
        # Constant index map -> block stays resident across the whole grid.
        return pl.BlockSpec(shape, lambda i: (0, 0))

    return pl.pallas_call(
        mlp_kernel,
        out_shape=jax.ShapeDtypeStruct((N, D_out), x.dtype),
        grid_spec=pltpu.PrefetchScalarGridSpec(
            num_scalar_prefetch=0,
            grid=(N // tn,),
            in_specs=[
                pl.BlockSpec((tn, D_in), lambda i: (i, 0)),   # x row tile
                const_spec((D_in, H)),                        # W1^T (resident)
                const_spec((1, H)),                           # b1
                const_spec((H, D_out)),                       # W2^T (resident)
                const_spec((1, D_out)),                       # b2 + external bias
            ],
            out_specs=pl.BlockSpec((tn, D_out), lambda i: (i, 0)),
        ),
        compiler_params=pltpu.CompilerParams(
            dimension_semantics=("parallel",)),
        cost_estimate=cost,
    )(x, w1_t, b1, w2_t, b2_eff)


def init_linear_params(key, fan_in, fan_out, dtype=jnp.float32):
    """Deterministic PyTorch-style init: U(-1/sqrt(fan_in), 1/sqrt(fan_in)).
    Weight is stored pre-transposed: [fan_in, fan_out]."""
    kw, kb = jax.random.split(key)
    bound = 1.0 / jnp.sqrt(float(fan_in))
    w_t = jax.random.uniform(kw, (fan_in, fan_out), dtype, -bound, bound)
    b = jax.random.uniform(kb, (1, fan_out), dtype, -bound, bound)
    return w_t, b


if __name__ == "__main__":
    # Small shapes consistent with the module: D_in=32, H=64, D_out=16, N=256.
    # With the new policy this runs as a single full-batch block (grid=(1,)).
    N, D_in, H, D_out = 256, 32, 64, 16
    key = jax.random.PRNGKey(0)
    kx, kbias, k1, k2 = jax.random.split(key, 4)

    x = jax.random.normal(kx, (N, D_in), jnp.float32)
    bias = jax.random.normal(kbias, (1, D_out), jnp.float32)
    w1_t, b1 = init_linear_params(k1, D_in, H)
    w2_t, b2 = init_linear_params(k2, H, D_out)

    y = extended_model_forward(x, w1_t, b1, w2_t, b2, bias)
    y = jax.block_until_ready(y)

    # Pure-JAX reference of the same forward pass.
    h_ref = jnp.maximum(x @ w1_t + b1.reshape(1, H), 0.0)
    y_ref = h_ref @ w2_t + b2.reshape(1, D_out) + bias
    assert y.shape == (N, D_out)
    assert jnp.allclose(y, y_ref, atol=1e-5, rtol=1e-5), \
        float(jnp.max(jnp.abs(y - y_ref)))

    print("KERNEL_OK")
</pallas_src>

<mosaic_0001>
module attributes {stable_mosaic.version = 11 : i64} {
  func.func @mlp_kernel(%arg0: i32, %arg1: memref<256x32xf32, #tpu.memory_space<vmem>>, %arg2: memref<32x64xf32, #tpu.memory_space<vmem>>, %arg3: memref<1x64xf32, #tpu.memory_space<vmem>>, %arg4: memref<64x16xf32, #tpu.memory_space<vmem>>, %arg5: memref<1x16xf32, #tpu.memory_space<vmem>>, %arg6: memref<256x16xf32, #tpu.memory_space<vmem>>) attributes {dimension_semantics = [#tpu.dimension_semantics<parallel>], iteration_bounds = array<i64: 1>, scalar_prefetch = 0 : i64, scratch_operands = 0 : i64, tpu.core_type = #tpu.core_type<tc>, window_params = [{transform_indices = @transform_0, window_bounds = array<i64: 256, 32>}, {pipeline_mode = #tpu.pipeline_mode<synchronous>, transform_indices = @transform_1, window_bounds = array<i64: 32, 64>}, {pipeline_mode = #tpu.pipeline_mode<synchronous>, transform_indices = @transform_2, window_bounds = array<i64: 1, 64>}, {pipeline_mode = #tpu.pipeline_mode<synchronous>, transform_indices = @transform_3, window_bounds = array<i64: 64, 16>}, {pipeline_mode = #tpu.pipeline_mode<synchronous>, transform_indices = @transform_4, window_bounds = array<i64: 1, 16>}, {transform_indices = @transform_5, window_bounds = array<i64: 256, 16>}]} {
    %c0 = arith.constant 0 : index
    %c0_0 = arith.constant 0 : index
    %0 = vector.load %arg1[%c0, %c0_0] : memref<256x32xf32, #tpu.memory_space<vmem>>, vector<256x32xf32>
    %c0_1 = arith.constant 0 : index
    %c0_2 = arith.constant 0 : index
    %1 = vector.load %arg2[%c0_1, %c0_2] : memref<32x64xf32, #tpu.memory_space<vmem>>, vector<32x64xf32>
    %cst = arith.constant dense<0.000000e+00> : vector<256x64xf32>
    %2 = tpu.matmul %0, %1, %cst {dimension_numbers = #tpu.dot_dimension_numbers<[1], [0], [0], [1], [0, 0, 1, 1], [], []>} : vector<256x32xf32>, vector<32x64xf32>, vector<256x64xf32> -> vector<256x64xf32>
    %c0_3 = arith.constant 0 : index
    %c0_4 = arith.constant 0 : index
    %3 = vector.load %arg3[%c0_3, %c0_4] : memref<1x64xf32, #tpu.memory_space<vmem>>, vector<1x64xf32>
    %4 = vector.broadcast %3 : vector<1x64xf32> to vector<256x64xf32>
    %5 = arith.addf %2, %4 : vector<256x64xf32>
    %cst_5 = arith.constant 0.000000e+00 : f32
    %6 = vector.broadcast %cst_5 : f32 to vector<256x64xf32>
    %7 = arith.maximumf %5, %6 : vector<256x64xf32>
    %c0_6 = arith.constant 0 : index
    %c0_7 = arith.constant 0 : index
    %8 = vector.load %arg4[%c0_6, %c0_7] : memref<64x16xf32, #tpu.memory_space<vmem>>, vector<64x16xf32>
    %cst_8 = arith.constant dense<0.000000e+00> : vector<256x16xf32>
    %9 = tpu.matmul %7, %8, %cst_8 {dimension_numbers = #tpu.dot_dimension_numbers<[1], [0], [0], [1], [0, 0, 1, 1], [], []>} : vector<256x64xf32>, vector<64x16xf32>, vector<256x16xf32> -> vector<256x16xf32>
    %c0_9 = arith.constant 0 : index
    %c0_10 = arith.constant 0 : index
    %10 = vector.load %arg5[%c0_9, %c0_10] : memref<1x16xf32, #tpu.memory_space<vmem>>, vector<1x16xf32>
    %11 = vector.broadcast %10 : vector<1x16xf32> to vector<256x16xf32>
    %12 = arith.addf %9, %11 : vector<256x16xf32>
    %c0_11 = arith.constant 0 : index
    %c0_12 = arith.constant 0 : index
    %13 = vector.load %arg6[%c0_11, %c0_12] : memref<256x16xf32, #tpu.memory_space<vmem>>, vector<256x16xf32>
    tpu.vector_store %arg6[%c0_11, %c0_12], %12 {strides = array<i32>} : memref<256x16xf32, #tpu.memory_space<vmem>>, vector<256x16xf32>,
    return
  }
  func.func @transform_0(%arg0: i32) -> (i32, i32) {
    %c0_i32 = arith.constant 0 : i32
    %c0_i32_0 = arith.constant 0 : i32
    return %arg0, %c0_i32 : i32, i32
  }
  func.func @transform_1(%arg0: i32) -> (i32, i32) {
    %c0_i32 = arith.constant 0 : i32
    %c0_i32_0 = arith.constant 0 : i32
    %c0_i32_1 = arith.constant 0 : i32
    return %c0_i32, %c0_i32_0 : i32, i32
  }
  func.func @transform_2(%arg0: i32) -> (i32, i32) {
    %c0_i32 = arith.constant 0 : i32
    %c0_i32_0 = arith.constant 0 : i32
    %c0_i32_1 = arith.constant 0 : i32
    return %c0_i32, %c0_i32_0 : i32, i32
  }
  func.func @transform_3(%arg0: i32) -> (i32, i32) {
    %c0_i32 = arith.constant 0 : i32
    %c0_i32_0 = arith.constant 0 : i32
    %c0_i32_1 = arith.constant 0 : i32
    return %c0_i32, %c0_i32_0 : i32, i32
  }
  func.func @transform_4(%arg0: i32) -> (i32, i32) {
    %c0_i32 = arith.constant 0 : i32
    %c0_i32_0 = arith.constant 0 : i32
    %c0_i32_1 = arith.constant 0 : i32
    return %c0_i32, %c0_i32_0 : i32, i32
  }
  func.func @transform_5(%arg0: i32) -> (i32, i32) {
    %c0_i32 = arith.constant 0 : i32
    %c0_i32_0 = arith.constant 0 : i32
    return %arg0, %c0_i32 : i32, i32
  }
}

</mosaic_0001>

<bundles_post_ra>
// kernel: tpu_custom_call.1
= control target key start
LH: loop header
LB: loop body
LE: loop exit
PB: predicated region body
PF: predicated region fallthrough
CT: control target
= control target key end

     0   :  { %vm63_vm0 = vcmask 261120   ;;  %vm432_vm1 = vcmask 523264   ;;  %vm754_vm2 = vcmask 130048   ;;  %s1497_s1 = inlined_call_operand.vmem [shape: f32[32,64], index: 1, kind: input, shape index: {}]   ;;  %s1498_s0 = inlined_call_operand.vmem [shape: f32[256,32], index: 0, kind: input, shape index: {}]   ;;  %s1499_s3 = inlined_call_operand.vmem [shape: f32[64,16], index: 3, kind: input, shape index: {}]   ;;  %s1500_s2 = inlined_call_operand.vmem [shape: f32[1,64], index: 2, kind: input, shape index: {}]   ;;  %s1501_s4 = inlined_call_operand.vmem [shape: f32[1,16], index: 4, kind: input, shape index: {}]   ;;  %s1502_s5 = inlined_call_operand.vmem [shape: f32[256,16], index: 5, kind: output, shape index: {}]  }
   0x1   :  { %v55_v0 = vld [vmem:[%s1497_s1 + $0x18] sm:$0xff]  ;;  %v54_v1 = vld [vmem:[%s1497_s1 + $0x10] sm:$0xff]  ;;  %v20_v2 = vld [vmem:[%s1498_s0] sm:$0xff] }
   0x2   :  { %933 = vmatprep.subr.mxu0 %v55_v0  ;;  %v53_v3 = vld [vmem:[%s1497_s1 + $0x8] sm:$0xff]  ;;  %941 = vmatprep.mubr.msk.f32.mxu0 %vm63_vm0, %v20_v2  ;;  %v52_v4 = vld [vmem:[%s1497_s1] sm:$0xff]  ;;  %v22_v6 = vld [vmem:[%s1498_s0 + $0x10] sm:$0xff] }
   0x3   :  { %934 = vmatpush3.msra.mxu0 %v55_v0  ;;  %v21_v5 = vld [vmem:[%s1498_s0 + $0x8] sm:$0xff]  ;;  %v23_v7 = vld [vmem:[%s1498_s0 + $0x18] sm:$0xff]  ;;  %v24_v8 = vld [vmem:[%s1498_s0 + $0x20] sm:$0xff] }
   0x4   :  { %935 = vmatprep.subr.mxu0 %v54_v1  ;;  %v424_v9 = vld [vmem:[%s1499_s3 + $0x38] sm:$0xff]  ;;  %v423_v10 = vld [vmem:[%s1499_s3 + $0x30] sm:$0xff]  ;;  %v25_v11 = vld [vmem:[%s1498_s0 + $0x28] sm:$0xff] }
   0x5   :  { %936 = vmatpush3.msra.mxu0 %v54_v1  ;;  %v422_v12 = vld [vmem:[%s1499_s3 + $0x28] sm:$0xff]  ;;  %v26_v13 = vld [vmem:[%s1498_s0 + $0x30] sm:$0xff]  ;;  %1053 = vmatprep.subr.mxu1 %v424_v9  ;;  %v421_v14 = vld [vmem:[%s1499_s3 + $0x20] sm:$0xff] }
   0x6   :  { %937 = vmatprep.subr.mxu0 %v53_v3  ;;  %1061 = vmatpush3.msra.mxu1 %v424_v9  ;;  %v27_v15 = vld [vmem:[%s1498_s0 + $0x38] sm:$0xff]  ;;  %v28_v16 = vld [vmem:[%s1498_s0 + $0x40] sm:$0xff]  ;;  %v29_v17 = vld [vmem:[%s1498_s0 + $0x48] sm:$0xff] }
   0x7   :  { %938 = vmatpush3.msra.mxu0 %v53_v3  ;;  %1054 = vmatprep.subr.mxu1 %v423_v10  ;;  %v30_v18 = vld [vmem:[%s1498_s0 + $0x50] sm:$0xff]  ;;  %v31_v19 = vld [vmem:[%s1498_s0 + $0x58] sm:$0xff]  ;;  %v32_v20 = vld [vmem:[%s1498_s0 + $0x60] sm:$0xff] }
   0x8   :  { %939 = vmatprep.subr.mxu0 %v52_v4  ;;  %1062 = vmatpush3.msra.mxu1 %v423_v10  ;;  %v33_v21 = vld [vmem:[%s1498_s0 + $0x68] sm:$0xff]  ;;  %v34_v22 = vld [vmem:[%s1498_s0 + $0x70] sm:$0xff]  ;;  %v35_v23 = vld [vmem:[%s1498_s0 + $0x78] sm:$0xff] }
   0x9   :  { %940 = vmatpush3.msra.mxu0 %v52_v4  ;;  %1055 = vmatprep.subr.mxu1 %v422_v12  ;;  %v36_v24 = vld [vmem:[%s1498_s0 + $0x80] sm:$0xff]  ;;  %v37_v25 = vld [vmem:[%s1498_s0 + $0x88] sm:$0xff]  ;;  %v38_v26 = vld [vmem:[%s1498_s0 + $0x90] sm:$0xff] }
   0xa   :  { %942 = vmatmul.mubr.msk.f32.vlgmr.msra.gmra.mxu0 %vm63_vm0, %v21_v5  ;;  %989 = vmatprep.subr.mxu0 %v424_v9  ;;  %v39_v27 = vld [vmem:[%s1498_s0 + $0x98] sm:$0xff]  ;;  %v40_v28 = vld [vmem:[%s1498_s0 + $0xa0] sm:$0xff]  ;;  %v41_v29 = vld [vmem:[%s1498_s0 + $0xa8] sm:$0xff] }
   0xb   :  { %944 = vmatprep.mubr.msk.f32.mxu0 %vm63_vm0, %v22_v6  ;;  %990 = vmatpush3.msra.mxu0 %v424_v9  ;;  %v42_v30 = vld [vmem:[%s1498_s0 + $0xb0] sm:$0xff]  ;;  %v43_v31 = vld [vmem:[%s1498_s0 + $0xb8] sm:$0xff]  ;;  %v44_v32 = vld [vmem:[%s1498_s0 + $0xc0] sm:$0xff] }
   0xc   :  { %991 = vmatprep.subr.mxu0 %v423_v10  ;;  %1063 = vmatpush3.msra.mxu1 %v422_v12  ;;  %v45_v33 = vld [vmem:[%s1498_s0 + $0xc8] sm:$0xff]  ;;  %v46_v34 = vld [vmem:[%s1498_s0 + $0xd0] sm:$0xff]  ;;  %v47_v35 = vld [vmem:[%s1498_s0 + $0xd8] sm:$0xff] }
   0xd   :  { %992 = vmatpush3.msra.mxu0 %v423_v10  ;;  %1056 = vmatprep.subr.mxu1 %v421_v14  ;;  %v48_v36 = vld [vmem:[%s1498_s0 + $0xe0] sm:$0xff]  ;;  %v49_v37 = vld [vmem:[%s1498_s0 + $0xe8] sm:$0xff]  ;;  %v50_v38 = vld [vmem:[%s1498_s0 + $0xf0] sm:$0xff] }
   0xe   :  { %945 = vmatmul.mubr.msk.f32.gmra.mxu0 %vm63_vm0, %v23_v7  ;;  %993 = vmatprep.subr.mxu0 %v422_v12  ;;  %v51_v39 = vld [vmem:[%s1498_s0 + $0xf8] sm:$0xff]  ;;  %v419_v41 = vld [vmem:[%s1499_s3 + $0x10] sm:$0xff]  ;;  %v418_v42 = vld [vmem:[%s1499_s3 + $0x8] sm:$0xff] }
   0xf   :  { %947 = vmatprep.mubr.msk.f32.mxu0 %vm63_vm0, %v24_v8  ;;  %994 = vmatpush3.msra.mxu0 %v422_v12  ;;  %v420_v40 = vld [vmem:[%s1499_s3 + $0x18] sm:$0xff]  ;;  %v417_v43 = vld [vmem:[%s1499_s3] sm:$0xff] }
  0x10   :  { %995 = vmatprep.subr.mxu0 %v421_v14  ;;  %1064 = vmatpush3.msra.mxu1 %v421_v14  ;;  %v1266_v44 = vld [vmem:[%s1500_s2] ss:$0 sm:$0xff] }
  0x11   :  { %996 = vmatpush3.msra.mxu0 %v421_v14  ;;  %1057 = vmatprep.subr.mxu1 %v420_v40 }
  0x12   :  { %948 = vmatmul.mubr.msk.f32.gmra.mxu0 %vm63_vm0, %v25_v11  ;;  %997 = vmatprep.subr.mxu0 %v420_v40 }
  0x13   :  { %950 = vmatprep.mubr.msk.f32.mxu0 %vm63_vm0, %v26_v13  ;;  %998 = vmatpush3.msra.mxu0 %v420_v40 }
  0x14   :  { %1065 = vmatpush3.msra.mxu1 %v420_v40  ;;  %999 = vmatprep.subr.mxu0 %v419_v41 }
  0x15   :  { %1058 = vmatprep.subr.mxu1 %v419_v41  ;;  %1000 = vmatpush3.msra.mxu0 %v419_v41 }
  0x16   :  { %951 = vmatmul.mubr.msk.f32.gmra.mxu0 %vm63_vm0, %v27_v15  ;;  %1066 = vmatpush3.msra.mxu1 %v419_v41 }
  0x17   :  { %953 = vmatprep.mubr.msk.f32.mxu0 %vm63_vm0, %v28_v16  ;;  %1001 = vmatprep.subr.mxu0 %v418_v42 }
  0x18   :  { %1059 = vmatprep.subr.mxu1 %v418_v42  ;;  %1002 = vmatpush3.msra.mxu0 %v418_v42 }
  0x19   :  { %1067 = vmatpush3.msra.mxu1 %v418_v42  ;;  %1003 = vmatprep.subr.mxu0 %v417_v43 }
  0x1a   :  { %954 = vmatmul.mubr.msk.f32.gmra.mxu0 %vm63_vm0, %v29_v17  ;;  %1060 = vmatprep.subr.mxu1 %v417_v43 }
  0x1b   :  { %956 = vmatprep.mubr.msk.f32.mxu0 %vm63_vm0, %v30_v18  ;;  %1004 = vmatpush3.msra.mxu0 %v417_v43 }
  0x1c   :  { %1068 = vmatpush3.msra.mxu1 %v417_v43 }
  0x1e   :  { %957 = vmatmul.mubr.msk.f32.gmra.mxu0 %vm63_vm0, %v31_v19 }
  0x1f   :  { %959 = vmatprep.mubr.msk.f32.mxu0 %vm63_vm0, %v32_v20 }
  0x22   :  { %960 = vmatmul.mubr.msk.f32.gmra.mxu0 %vm63_vm0, %v33_v21 }
  0x23   :  { %962 = vmatprep.mubr.msk.f32.mxu0 %vm63_vm0, %v34_v22 }
  0x26   :  { %963 = vmatmul.mubr.msk.f32.gmra.mxu0 %vm63_vm0, %v35_v23 }
  0x27   :  { %965 = vmatprep.mubr.msk.f32.mxu0 %vm63_vm0, %v36_v24 }
  0x2a   :  { %966 = vmatmul.mubr.msk.f32.gmra.mxu0 %vm63_vm0, %v37_v25 }
  0x2b   :  { %968 = vmatprep.mubr.msk.f32.mxu0 %vm63_vm0, %v38_v26 }
  0x2e   :  { %969 = vmatmul.mubr.msk.f32.gmra.mxu0 %vm63_vm0, %v39_v27 }
  0x2f   :  { %971 = vmatprep.mubr.msk.f32.mxu0 %vm63_vm0, %v40_v28 }
  0x32   :  { %972 = vmatmul.mubr.msk.f32.gmra.mxu0 %vm63_vm0, %v41_v29 }
  0x33   :  { %974 = vmatprep.mubr.msk.f32.mxu0 %vm63_vm0, %v42_v30 }
  0x36   :  { %975 = vmatmul.mubr.msk.f32.gmra.mxu0 %vm63_vm0, %v43_v31 }
  0x37   :  { %977 = vmatprep.mubr.msk.f32.mxu0 %vm63_vm0, %v44_v32 }
  0x3a   :  { %978 = vmatmul.mubr.msk.f32.gmra.mxu0 %vm63_vm0, %v45_v33 }
  0x3b   :  { %980 = vmatprep.mubr.msk.f32.mxu0 %vm63_vm0, %v46_v34 }
  0x3e   :  { %981 = vmatmul.mubr.msk.f32.gmra.mxu0 %vm63_vm0, %v47_v35 }
  0x3f   :  { %983 = vmatprep.mubr.msk.f32.mxu0 %vm63_vm0, %v48_v36 }
  0x42   :  { %984 = vmatmul.mubr.msk.f32.gmra.mxu0 %vm63_vm0, %v49_v37 }
  0x43   :  { %986 = vmatprep.mubr.msk.f32.mxu0 %vm63_vm0, %v50_v38 }
  0x46   :  { %987 = vmatmul.mubr.msk.f32.gmra.mxu0 %vm63_vm0, %v51_v39 }
  0xca   :  { %v943_v45 = vpop.f32.mrf.mxu0 }
  0xcb   :  { %v232_v46 = vadd.f32 %v943_v45, %v1266_v44 }
  0xcc   :  { %v226_v47 = vpop.f32.mrf.mxu0 }
  0xcd   :  { %v227_v48 = vadd.f32 %v1266_v44, %v226_v47  ;;  %v386_v51 = vmax.f32 %v232_v46, 0.0 }
  0xce   :  { %v946_v49 = vpop.f32.mrf.mxu0 }
  0xcf   :  { %v385_v50 = vmax.f32 %v227_v48, 0.0  ;;  %v242_v52 = vadd.f32 %v946_v49, %v1266_v44 }
  0xd0   :  { %v236_v53 = vpop.f32.mrf.mxu0 }
  0xd1   :  { %v237_v54 = vadd.f32 %v1266_v44, %v236_v53  ;;  %1005 = vmatprep.mubr.msk.f32.mxu0 %vm432_vm1, %v385_v50  ;;  %v388_v57 = vmax.f32 %v242_v52, 0.0 }
  0xd2   :  { %v949_v55 = vpop.f32.mrf.mxu0  ;;  %1006 = vmatmul.mubr.msk.f32.vlgmr.msra.gmra.mxu0 %vm432_vm1, %v386_v51 }
  0xd3   :  { %v387_v56 = vmax.f32 %v237_v54, 0.0  ;;  %v252_v58 = vadd.f32 %v949_v55, %v1266_v44 }
  0xd4   :  { %v246_v59 = vpop.f32.mrf.mxu0 }
  0xd5   :  { %v247_v60 = vadd.f32 %v1266_v44, %v246_v59  ;;  %1008 = vmatprep.mubr.msk.f32.mxu1 %vm432_vm1, %v387_v56  ;;  %v390_v63 = vmax.f32 %v252_v58, 0.0 }
  0xd6   :  { %v952_v61 = vpop.f32.mrf.mxu0  ;;  %1009 = vmatmul.mubr.msk.f32.vlgmr.msra.gmra.mxu1 %vm432_vm1, %v388_v57 }
  0xd7   :  { %v389_v62 = vmax.f32 %v247_v60, 0.0  ;;  %v262_v0 = vadd.f32 %v952_v61, %v1266_v44 }
  0xd8   :  { %v256_v1 = vpop.f32.mrf.mxu0 }
  0xd9   :  { %v257_v2 = vadd.f32 %v1266_v44, %v256_v1  ;;  %1011 = vmatprep.mubr.msk.f32.mxu1 %vm432_vm1, %v389_v62  ;;  %v392_v5 = vmax.f32 %v262_v0, 0.0 }
  0xda   :  { %v955_v3 = vpop.f32.mrf.mxu0  ;;  %1012 = vmatmul.mubr.msk.f32.gmra.mxu1 %vm432_vm1, %v390_v63 }
  0xdb   :  { %v391_v4 = vmax.f32 %v257_v2, 0.0  ;;  %v272_v6 = vadd.f32 %v955_v3, %v1266_v44 }
  0xdc   :  { %v266_v7 = vpop.f32.mrf.mxu0 }
  0xdd   :  { %v267_v8 = vadd.f32 %v1266_v44, %v266_v7  ;;  %1014 = vmatprep.mubr.msk.f32.mxu1 %vm432_vm1, %v391_v4  ;;  %v394_v11 = vmax.f32 %v272_v6, 0.0 }
  0xde   :  { %v958_v9 = vpop.f32.mrf.mxu0  ;;  %1015 = vmatmul.mubr.msk.f32.gmra.mxu1 %vm432_vm1, %v392_v5 }
  0xdf   :  { %v393_v10 = vmax.f32 %v267_v8, 0.0  ;;  %v282_v12 = vadd.f32 %v958_v9, %v1266_v44 }
  0xe0   :  { %v276_v13 = vpop.f32.mrf.mxu0 }
  0xe1   :  { %v277_v14 = vadd.f32 %v1266_v44, %v276_v13  ;;  %1017 = vmatprep.mubr.msk.f32.mxu1 %vm432_vm1, %v393_v10  ;;  %v396_v17 = vmax.f32 %v282_v12, 0.0 }
  0xe2   :  { %v961_v15 = vpop.f32.mrf.mxu0  ;;  %1018 = vmatmul.mubr.msk.f32.gmra.mxu1 %vm432_vm1, %v394_v11 }
  0xe3   :  { %v395_v16 = vmax.f32 %v277_v14, 0.0  ;;  %v292_v18 = vadd.f32 %v961_v15, %v1266_v44  ;;  %v1335_v14 = vld [vmem:[%s1501_s4] ss:$0 sm:$0xff] }
  0xe4   :  { %v286_v19 = vpop.f32.mrf.mxu0 }
  0xe5   :  { %v287_v20 = vadd.f32 %v1266_v44, %v286_v19  ;;  %1020 = vmatprep.mubr.msk.f32.mxu1 %vm432_vm1, %v395_v16  ;;  %v398_v23 = vmax.f32 %v292_v18, 0.0 }
  0xe6   :  { %v964_v21 = vpop.f32.mrf.mxu0  ;;  %1021 = vmatmul.mubr.msk.f32.gmra.mxu1 %vm432_vm1, %v396_v17 }
  0xe7   :  { %v397_v22 = vmax.f32 %v287_v20, 0.0  ;;  %v302_v24 = vadd.f32 %v964_v21, %v1266_v44 }
  0xe8   :  { %v296_v25 = vpop.f32.mrf.mxu0 }
  0xe9   :  { %v297_v26 = vadd.f32 %v1266_v44, %v296_v25  ;;  %1023 = vmatprep.mubr.msk.f32.mxu1 %vm432_vm1, %v397_v22  ;;  %v400_v29 = vmax.f32 %v302_v24, 0.0 }
  0xea   :  { %v967_v27 = vpop.f32.mrf.mxu0  ;;  %1024 = vmatmul.mubr.msk.f32.gmra.mxu1 %vm432_vm1, %v398_v23 }
  0xeb   :  { %v399_v28 = vmax.f32 %v297_v26, 0.0  ;;  %v312_v30 = vadd.f32 %v967_v27, %v1266_v44 }
  0xec   :  { %v306_v31 = vpop.f32.mrf.mxu0 }
  0xed   :  { %v307_v32 = vadd.f32 %v1266_v44, %v306_v31  ;;  %1026 = vmatprep.mubr.msk.f32.mxu1 %vm432_vm1, %v399_v28  ;;  %v402_v35 = vmax.f32 %v312_v30, 0.0 }
  0xee   :  { %v970_v33 = vpop.f32.mrf.mxu0  ;;  %1027 = vmatmul.mubr.msk.f32.gmra.mxu1 %vm432_vm1, %v400_v29 }
  0xef   :  { %v401_v34 = vmax.f32 %v307_v32, 0.0  ;;  %v322_v36 = vadd.f32 %v970_v33, %v1266_v44 }
  0xf0   :  { %v316_v37 = vpop.f32.mrf.mxu0 }
  0xf1   :  { %v317_v38 = vadd.f32 %v1266_v44, %v316_v37  ;;  %1029 = vmatprep.mubr.msk.f32.mxu1 %vm432_vm1, %v401_v34  ;;  %v404_v41 = vmax.f32 %v322_v36, 0.0 }
  0xf2   :  { %v973_v39 = vpop.f32.mrf.mxu0  ;;  %1030 = vmatmul.mubr.msk.f32.gmra.mxu1 %vm432_vm1, %v402_v35 }
  0xf3   :  { %v403_v40 = vmax.f32 %v317_v38, 0.0  ;;  %v332_v42 = vadd.f32 %v973_v39, %v1266_v44 }
  0xf4   :  { %v326_v43 = vpop.f32.mrf.mxu0 }
  0xf5   :  { %v327_v45 = vadd.f32 %v1266_v44, %v326_v43  ;;  %1032 = vmatprep.mubr.msk.f32.mxu1 %vm432_vm1, %v403_v40  ;;  %v406_v48 = vmax.f32 %v332_v42, 0.0 }
  0xf6   :  { %v976_v46 = vpop.f32.mrf.mxu0  ;;  %1033 = vmatmul.mubr.msk.f32.gmra.mxu1 %vm432_vm1, %v404_v41 }
  0xf7   :  { %v405_v47 = vmax.f32 %v327_v45, 0.0  ;;  %v342_v49 = vadd.f32 %v976_v46, %v1266_v44 }
  0xf8   :  { %v336_v50 = vpop.f32.mrf.mxu0 }
  0xf9   :  { %v337_v51 = vadd.f32 %v1266_v44, %v336_v50  ;;  %1035 = vmatprep.mubr.msk.f32.mxu1 %vm432_vm1, %v405_v47  ;;  %v408_v54 = vmax.f32 %v342_v49, 0.0 }
  0xfa   :  { %v979_v52 = vpop.f32.mrf.mxu0  ;;  %1036 = vmatmul.mubr.msk.f32.gmra.mxu1 %vm432_vm1, %v406_v48 }
  0xfb   :  { %v407_v53 = vmax.f32 %v337_v51, 0.0  ;;  %v352_v55 = vadd.f32 %v979_v52, %v1266_v44 }
  0xfc   :  { %v346_v56 = vpop.f32.mrf.mxu0 }
  0xfd   :  { %v347_v57 = vadd.f32 %v1266_v44, %v346_v56  ;;  %1038 = vmatprep.mubr.msk.f32.mxu1 %vm432_vm1, %v407_v53  ;;  %v410_v60 = vmax.f32 %v352_v55, 0.0 }
  0xfe   :  { %v982_v58 = vpop.f32.mrf.mxu0  ;;  %1039 = vmatmul.mubr.msk.f32.gmra.mxu1 %vm432_vm1, %v408_v54 }
  0xff   :  { %v409_v59 = vmax.f32 %v347_v57, 0.0  ;;  %v362_v61 = vadd.f32 %v982_v58, %v1266_v44 }
 0x100   :  { %v356_v62 = vpop.f32.mrf.mxu0 }
 0x101   :  { %v357_v63 = vadd.f32 %v1266_v44, %v356_v62  ;;  %1041 = vmatprep.mubr.msk.f32.mxu1 %vm432_vm1, %v409_v59  ;;  %v412_v2 = vmax.f32 %v362_v61, 0.0 }
 0x102   :  { %v985_v0 = vpop.f32.mrf.mxu0  ;;  %1042 = vmatmul.mubr.msk.f32.gmra.mxu1 %vm432_vm1, %v410_v60 }
 0x103   :  { %v411_v1 = vmax.f32 %v357_v63, 0.0  ;;  %v372_v3 = vadd.f32 %v985_v0, %v1266_v44 }
 0x104   :  { %v366_v4 = vpop.f32.mrf.mxu0 }
 0x105   :  { %v367_v5 = vadd.f32 %v1266_v44, %v366_v4  ;;  %1044 = vmatprep.mubr.msk.f32.mxu1 %vm432_vm1, %v411_v1  ;;  %v414_v8 = vmax.f32 %v372_v3, 0.0 }
 0x106   :  { %v988_v6 = vpop.f32.mrf.mxu0  ;;  %1045 = vmatmul.mubr.msk.f32.gmra.mxu1 %vm432_vm1, %v412_v2 }
 0x107   :  { %v413_v7 = vmax.f32 %v367_v5, 0.0  ;;  %v382_v9 = vadd.f32 %v988_v6, %v1266_v44 }
 0x108   :  { %v376_v10 = vpop.f32.mrf.mxu0 }
 0x109   :  { %v377_v11 = vadd.f32 %v1266_v44, %v376_v10  ;;  %1047 = vmatprep.mubr.msk.f32.mxu1 %vm432_vm1, %v413_v7  ;;  %v416_v13 = vmax.f32 %v382_v9, 0.0 }
 0x10a   :  { %1048 = vmatmul.mubr.msk.f32.gmra.mxu1 %vm432_vm1, %v414_v8 }
 0x10b   :  { %v415_v12 = vmax.f32 %v377_v11, 0.0 }
 0x10d   :  { %1050 = vmatprep.mubr.msk.f32.mxu1 %vm432_vm1, %v415_v12 }
 0x10e   :  { %1051 = vmatmul.mubr.msk.f32.gmra.mxu1 %vm432_vm1, %v416_v13 }
 0x192   :  { %v1007_v15 = vpop.f32.mrf.mxu0 }
 0x193   :  { %v601_v16 = vadd.f32 %v1007_v15, %v1335_v14 }
 0x194   :  { %v595_v44 = vpop.f32.mrf.mxu0 }
 0x195   :  { %756 = vst.msk [vmem:[%s1502_s5 + $0x8] sm:$0xff] %vm754_vm2, %v601_v16  ;;  %v596_v17 = vadd.f32 %v1335_v14, %v595_v44 }
 0x196   :  { %v1010_v18 = vpop.f32.mrf.mxu1 }
 0x197   :  { %755 = vst.msk [vmem:[%s1502_s5] sm:$0xff] %vm754_vm2, %v596_v17  ;;  %v611_v19 = vadd.f32 %v1010_v18, %v1335_v14 }
 0x198   :  { %v605_v20 = vpop.f32.mrf.mxu1 }
 0x199   :  { %758 = vst.msk [vmem:[%s1502_s5 + $0x18] sm:$0xff] %vm754_vm2, %v611_v19  ;;  %v606_v21 = vadd.f32 %v1335_v14, %v605_v20 }
 0x19a   :  { %v1013_v22 = vpop.f32.mrf.mxu1 }
 0x19b   :  { %757 = vst.msk [vmem:[%s1502_s5 + $0x10] sm:$0xff] %vm754_vm2, %v606_v21  ;;  %v621_v23 = vadd.f32 %v1013_v22, %v1335_v14 }
 0x19c   :  { %v615_v24 = vpop.f32.mrf.mxu1 }
 0x19d   :  { %760 = vst.msk [vmem:[%s1502_s5 + $0x28] sm:$0xff] %vm754_vm2, %v621_v23  ;;  %v616_v25 = vadd.f32 %v1335_v14, %v615_v24 }
 0x19e   :  { %v1016_v26 = vpop.f32.mrf.mxu1 }
 0x19f   :  { %759 = vst.msk [vmem:[%s1502_s5 + $0x20] sm:$0xff] %vm754_vm2, %v616_v25  ;;  %v631_v27 = vadd.f32 %v1016_v26, %v1335_v14 }
 0x1a0   :  { %v625_v28 = vpop.f32.mrf.mxu1 }
 0x1a1   :  { %762 = vst.msk [vmem:[%s1502_s5 + $0x38] sm:$0xff] %vm754_vm2, %v631_v27  ;;  %v626_v29 = vadd.f32 %v1335_v14, %v625_v28 }
 0x1a2   :  { %v1019_v30 = vpop.f32.mrf.mxu1 }
 0x1a3   :  { %761 = vst.msk [vmem:[%s1502_s5 + $0x30] sm:$0xff] %vm754_vm2, %v626_v29  ;;  %v641_v31 = vadd.f32 %v1019_v30, %v1335_v14 }
 0x1a4   :  { %v635_v32 = vpop.f32.mrf.mxu1 }
 0x1a5   :  { %764 = vst.msk [vmem:[%s1502_s5 + $0x48] sm:$0xff] %vm754_vm2, %v641_v31  ;;  %v636_v33 = vadd.f32 %v1335_v14, %v635_v32 }
 0x1a6   :  { %v1022_v34 = vpop.f32.mrf.mxu1 }
 0x1a7   :  { %763 = vst.msk [vmem:[%s1502_s5 + $0x40] sm:$0xff] %vm754_vm2, %v636_v33  ;;  %v651_v35 = vadd.f32 %v1022_v34, %v1335_v14 }
 0x1a8   :  { %v645_v36 = vpop.f32.mrf.mxu1 }
 0x1a9   :  { %766 = vst.msk [vmem:[%s1502_s5 + $0x58] sm:$0xff] %vm754_vm2, %v651_v35  ;;  %v646_v37 = vadd.f32 %v1335_v14, %v645_v36 }
 0x1aa   :  { %v1025_v38 = vpop.f32.mrf.mxu1 }
 0x1ab   :  { %765 = vst.msk [vmem:[%s1502_s5 + $0x50] sm:$0xff] %vm754_vm2, %v646_v37  ;;  %v661_v39 = vadd.f32 %v1025_v38, %v1335_v14 }
 0x1ac   :  { %v655_v40 = vpop.f32.mrf.mxu1 }
 0x1ad   :  { %768 = vst.msk [vmem:[%s1502_s5 + $0x68] sm:$0xff] %vm754_vm2, %v661_v39  ;;  %v656_v41 = vadd.f32 %v1335_v14, %v655_v40 }
 0x1ae   :  { %v1028_v42 = vpop.f32.mrf.mxu1 }
 0x1af   :  { %767 = vst.msk [vmem:[%s1502_s5 + $0x60] sm:$0xff] %vm754_vm2, %v656_v41  ;;  %v671_v43 = vadd.f32 %v1028_v42, %v1335_v14 }
 0x1b0   :  { %v665_v45 = vpop.f32.mrf.mxu1 }
 0x1b1   :  { %770 = vst.msk [vmem:[%s1502_s5 + $0x78] sm:$0xff] %vm754_vm2, %v671_v43  ;;  %v666_v46 = vadd.f32 %v1335_v14, %v665_v45 }
 0x1b2   :  { %v1031_v47 = vpop.f32.mrf.mxu1 }
 0x1b3   :  { %769 = vst.msk [vmem:[%s1502_s5 + $0x70] sm:$0xff] %vm754_vm2, %v666_v46  ;;  %v681_v48 = vadd.f32 %v1031_v47, %v1335_v14 }
 0x1b4   :  { %v675_v49 = vpop.f32.mrf.mxu1 }
 0x1b5   :  { %772 = vst.msk [vmem:[%s1502_s5 + $0x88] sm:$0xff] %vm754_vm2, %v681_v48  ;;  %v676_v50 = vadd.f32 %v1335_v14, %v675_v49 }
 0x1b6   :  { %v1034_v51 = vpop.f32.mrf.mxu1 }
 0x1b7   :  { %771 = vst.msk [vmem:[%s1502_s5 + $0x80] sm:$0xff] %vm754_vm2, %v676_v50  ;;  %v691_v52 = vadd.f32 %v1034_v51, %v1335_v14 }
 0x1b8   :  { %v685_v53 = vpop.f32.mrf.mxu1 }
 0x1b9   :  { %774 = vst.msk [vmem:[%s1502_s5 + $0x98] sm:$0xff] %vm754_vm2, %v691_v52  ;;  %v686_v54 = vadd.f32 %v1335_v14, %v685_v53 }
 0x1ba   :  { %v1037_v55 = vpop.f32.mrf.mxu1 }
 0x1bb   :  { %773 = vst.msk [vmem:[%s1502_s5 + $0x90] sm:$0xff] %vm754_vm2, %v686_v54  ;;  %v701_v56 = vadd.f32 %v1037_v55, %v1335_v14 }
 0x1bc   :  { %v695_v57 = vpop.f32.mrf.mxu1 }
 0x1bd   :  { %776 = vst.msk [vmem:[%s1502_s5 + $0xa8] sm:$0xff] %vm754_vm2, %v701_v56  ;;  %v696_v58 = vadd.f32 %v1335_v14, %v695_v57 }
 0x1be   :  { %v1040_v59 = vpop.f32.mrf.mxu1 }
 0x1bf   :  { %775 = vst.msk [vmem:[%s1502_s5 + $0xa0] sm:$0xff] %vm754_vm2, %v696_v58  ;;  %v711_v60 = vadd.f32 %v1040_v59, %v1335_v14 }
 0x1c0   :  { %v705_v61 = vpop.f32.mrf.mxu1 }
 0x1c1   :  { %778 = vst.msk [vmem:[%s1502_s5 + $0xb8] sm:$0xff] %vm754_vm2, %v711_v60  ;;  %v706_v62 = vadd.f32 %v1335_v14, %v705_v61 }
 0x1c2   :  { %v1043_v63 = vpop.f32.mrf.mxu1 }
 0x1c3   :  { %777 = vst.msk [vmem:[%s1502_s5 + $0xb0] sm:$0xff] %vm754_vm2, %v706_v62  ;;  %v721_v0 = vadd.f32 %v1043_v63, %v1335_v14 }
 0x1c4   :  { %v715_v1 = vpop.f32.mrf.mxu1 }
 0x1c5   :  { %780 = vst.msk [vmem:[%s1502_s5 + $0xc8] sm:$0xff] %vm754_vm2, %v721_v0  ;;  %v716_v2 = vadd.f32 %v1335_v14, %v715_v1 }
 0x1c6   :  { %v1046_v3 = vpop.f32.mrf.mxu1 }
 0x1c7   :  { %779 = vst.msk [vmem:[%s1502_s5 + $0xc0] sm:$0xff] %vm754_vm2, %v716_v2  ;;  %v731_v4 = vadd.f32 %v1046_v3, %v1335_v14 }
 0x1c8   :  { %v725_v5 = vpop.f32.mrf.mxu1 }
 0x1c9   :  { %782 = vst.msk [vmem:[%s1502_s5 + $0xd8] sm:$0xff] %vm754_vm2, %v731_v4  ;;  %v726_v6 = vadd.f32 %v1335_v14, %v725_v5 }
 0x1ca   :  { %v1049_v7 = vpop.f32.mrf.mxu1 }
 0x1cb   :  { %781 = vst.msk [vmem:[%s1502_s5 + $0xd0] sm:$0xff] %vm754_vm2, %v726_v6  ;;  %v741_v8 = vadd.f32 %v1049_v7, %v1335_v14 }
 0x1cc   :  { %v735_v9 = vpop.f32.mrf.mxu1 }
 0x1cd   :  { %784 = vst.msk [vmem:[%s1502_s5 + $0xe8] sm:$0xff] %vm754_vm2, %v741_v8  ;;  %v736_v10 = vadd.f32 %v1335_v14, %v735_v9 }
 0x1ce   :  { %v1052_v11 = vpop.f32.mrf.mxu1 }
 0x1cf   :  { %783 = vst.msk [vmem:[%s1502_s5 + $0xe0] sm:$0xff] %vm754_vm2, %v736_v10  ;;  %v751_v12 = vadd.f32 %v1052_v11, %v1335_v14 }
 0x1d0   :  { %v745_v13 = vpop.f32.mrf.mxu1 }
 0x1d1   :  { %786 = vst.msk [vmem:[%s1502_s5 + $0xf8] sm:$0xff] %vm754_vm2, %v751_v12  ;;  %v746_v15 = vadd.f32 %v1335_v14, %v745_v13 }
 0x1d3   :  { %785 = vst.msk [vmem:[%s1502_s5 + $0xf0] sm:$0xff] %vm754_vm2, %v746_v15 }

</bundles_post_ra>
